<compile_context>
chip_gen: v7x
topology: tpu7x:2x2x1
jax: 0.10.0
libtpu: 0.0.40
codegen_flags: <defaults>
</compile_context>

<pallas_src>
import functools

import jax
import jax.numpy as jnp
from jax import lax
from jax.experimental import pallas as pl
from jax.experimental.pallas import tpu as pltpu


# ----------------------------------------------------------------------------
# helpers
# ----------------------------------------------------------------------------
def _round_up(x, m):
    return (x + m - 1) // m * m


def _vmem_capacity_bytes():
    """Per-core VMEM capacity; conservative 64 MiB fallback."""
    try:
        info = pltpu.get_tpu_info()
        for name in ("vmem_capacity_bytes", "vmem_size_bytes", "vmem_bytes"):
            cap = getattr(info, name, None)
            if cap:
                return int(cap)
    except Exception:
        pass
    return 64 * 1024 * 1024


def _fit_tile(total, desired):
    """Largest tile <= desired that divides `total`; prefer multiples of 128."""
    desired = max(8, min(desired, total))
    t = desired - desired % 128
    while t >= 128:
        if total % t == 0:
            return t
        t -= 128
    t = desired - desired % 8
    while t >= 8:
        if total % t == 0:
            return t
        t -= 8
    return total


def _heads_per_block(num_heads, head_dim, max_lanes):
    """Pack heads so the attention block's last dim is a multiple of 128
    lanes (up to max_lanes), falling back to all heads (last dim == E)."""
    if head_dim <= max_lanes:
        for hpb in range(min(num_heads, max_lanes // head_dim), 0, -1):
            if num_heads % hpb == 0 and (hpb * head_dim) % 128 == 0:
                return hpb
    return num_heads


# ----------------------------------------------------------------------------
# Kernel 1: q/k/v projection.  grid = (B, T_pad//tm); weights stay resident.
# Each output is stored as soon as its dot finishes (bounded live accumulator).
# ----------------------------------------------------------------------------
def _qkv_proj_kernel(x_ref, wq_ref, wk_ref, wv_ref, bq_ref, bv_ref,
                     q_ref, k_ref, v_ref, *, dot_dtype):
    x = x_ref[0].astype(dot_dtype)                                   # (tm, E)
    q_ref[0] = (jnp.dot(x, wq_ref[...], preferred_element_type=jnp.float32)
                + bq_ref[...]).astype(q_ref.dtype)
    # k_proj has bias=False in Qwen2AudioAttention -> no bias add here.
    k_ref[0] = jnp.dot(x, wk_ref[...],
                       preferred_element_type=jnp.float32).astype(k_ref.dtype)
    v_ref[0] = (jnp.dot(x, wv_ref[...], preferred_element_type=jnp.float32)
                + bv_ref[...]).astype(v_ref.dtype)


# ----------------------------------------------------------------------------
# Kernel 2a: flash-style attention (no attention-weights output).
# grid = (B, H//hpb, T_pad//tq, T_pad//tk); kv axis innermost + "arbitrary".
# Per-head work = static lane-slice 2D matmuls; Q staging hoisted to j == 0.
# ----------------------------------------------------------------------------
def _flash_attn_kernel(q_ref, k_ref, v_ref, o_ref,
                       q_sc, m_sc, l_sc, acc_sc, *,
                       hpb, head_dim, dot_dtype, kv_len, kv_padded):
    j = pl.program_id(3)

    @pl.when(j == 0)
    def _init():
        q = q_ref[0].astype(dot_dtype)                               # (tq, hpb*Dh)
        for h in range(hpb):                                         # hoisted once
            q_sc[h] = q[:, h * head_dim:(h + 1) * head_dim]
        m_sc[...] = jnp.full(m_sc.shape, -jnp.inf, jnp.float32)
        l_sc[...] = jnp.zeros(l_sc.shape, jnp.float32)
        acc_sc[...] = jnp.zeros(acc_sc.shape, jnp.float32)

    k = k_ref[0].astype(dot_dtype)                                   # (tk, hpb*Dh)
    v = v_ref[0].astype(dot_dtype)
    tk = k.shape[0]
    if kv_padded:
        col = j * tk + lax.broadcasted_iota(jnp.int32, (1, tk), 1)
        valid = col < kv_len                                         # (1, tk)

    nt = (((1,), (1,)), ((), ()))   # contract last dims: q @ k^T, no batch dims
    for h in range(hpb):
        sl = slice(h * head_dim, (h + 1) * head_dim)
        s = lax.dot_general(q_sc[h], k[:, sl], nt,
                            preferred_element_type=jnp.float32)      # (tq, tk)
        if kv_padded:
            s = jnp.where(valid, s, -jnp.inf)
        m_prev = m_sc[h]                                             # (tq, 1)
        m_new = jnp.maximum(m_prev, jnp.max(s, axis=-1, keepdims=True))
        alpha = jnp.exp(m_prev - m_new)
        p = jnp.exp(s - m_new)
        l_sc[h] = alpha * l_sc[h] + jnp.sum(p, axis=-1, keepdims=True)
        acc_sc[h] = alpha * acc_sc[h] + jnp.dot(
            p.astype(dot_dtype), v[:, sl], preferred_element_type=jnp.float32)
        m_sc[h] = m_new

    @pl.when(j == pl.num_programs(3) - 1)
    def _finalize():
        outs = [acc_sc[h] * pl.reciprocal(l_sc[h], approx=True)
                for h in range(hpb)]
        o_ref[0] = jnp.concatenate(outs, axis=-1).astype(o_ref.dtype)


# ----------------------------------------------------------------------------
# Kernel 2b: attention WITH probability output (API-parity / debug path).
# grid = (B, H//hpb, T_pad//tq); full (padded+masked) KV, exact normalization.
# ----------------------------------------------------------------------------
def _attn_probs_kernel(q_ref, k_ref, v_ref, o_ref, w_ref, *,
                       hpb, head_dim, dot_dtype, kv_len, kv_padded):
    q = q_ref[0].astype(dot_dtype)                                   # (tq, hpb*Dh)
    k = k_ref[0].astype(dot_dtype)                                   # (Tp, hpb*Dh)
    v = v_ref[0].astype(dot_dtype)
    tkv = k.shape[0]
    if kv_padded:
        col = lax.broadcasted_iota(jnp.int32, (1, tkv), 1)
        valid = col < kv_len

    nt = (((1,), (1,)), ((), ()))
    outs = []
    for h in range(hpb):
        sl = slice(h * head_dim, (h + 1) * head_dim)
        s = lax.dot_general(q[:, sl], k[:, sl], nt,
                            preferred_element_type=jnp.float32)      # (tq, Tp)
        if kv_padded:
            s = jnp.where(valid, s, -jnp.inf)
        e = jnp.exp(s - jnp.max(s, axis=-1, keepdims=True))
        p = e / jnp.sum(e, axis=-1, keepdims=True)        # exact normalization
        w_ref[0, h] = p.astype(w_ref.dtype)
        outs.append(jnp.dot(p.astype(dot_dtype), v[:, sl],
                            preferred_element_type=jnp.float32))
    o_ref[0] = jnp.concatenate(outs, axis=-1).astype(o_ref.dtype)


# ----------------------------------------------------------------------------
# Kernel 3: output projection.  grid = (B, T_pad//tm).
# ----------------------------------------------------------------------------
def _out_proj_kernel(x_ref, w_ref, b_ref, o_ref, *, dot_dtype):
    x = x_ref[0].astype(dot_dtype)
    o_ref[0] = (jnp.dot(x, w_ref[...], preferred_element_type=jnp.float32)
                + b_ref[...]).astype(o_ref.dtype)


# ----------------------------------------------------------------------------
# Wrapper
# ----------------------------------------------------------------------------
def qwen2_audio_attention(hidden_states, params, num_heads, *,
                          output_attentions=False,
                          compute_dtype=jnp.bfloat16,
                          probs_dtype=jnp.float32,
                          q_tile=None, kv_tile=None, row_tile=None,
                          max_head_lanes=256,
                          vmem_limit_bytes=None):
    """Forward pass of Qwen2AudioAttention (self-attention, eval mode).

    Returns (attn_output, attn_weights, past_key_value) like the PyTorch
    module; attn_weights is None unless output_attentions=True; past_key_value
    is always None here.
    """
    B, T, E = hidden_states.shape
    H = num_heads
    assert E % H == 0, "embed_dim must be divisible by num_heads"
    Dh = E // H
    scaling = float(Dh) ** -0.5
    f32 = jnp.float32

    if params.get("k_proj_b") is not None:
        raise ValueError("Qwen2AudioAttention.k_proj has bias=False; "
                         "got a k_proj_b parameter.")

    # -------- generation-aware defaults (VMEM limit + tile sizes) -----------
    vmem_cap = _vmem_capacity_bytes()
    if vmem_limit_bytes is None:
        vmem_limit_bytes = int(vmem_cap * 0.75)   # ~96 MiB v5e/v6e, ~48 MiB v7x
    big_vmem = vmem_cap >= 96 * 1024 * 1024
    if row_tile is None:
        row_tile = 512 if big_vmem else 256
    if q_tile is None:
        q_tile = 512 if big_vmem else 256
    if kv_tile is None:
        kv_tile = 512

    # -------- pad T so tiles stay 128-aligned; padded keys are masked -------
    T_pad = _round_up(T, 128) if T > 128 else _round_up(T, 8)
    kv_padded = T_pad != T
    x = hidden_states
    if kv_padded:
        x = jnp.pad(x, ((0, 0), (0, T_pad - T), (0, 0)))

    tm = _fit_tile(T_pad, row_tile)
    tq = _fit_tile(T_pad, q_tile)
    tk = _fit_tile(T_pad, kv_tile)

    # -------- parameter prep (softmax scale folded into Wq / bq) ------------
    wq = (params["q_proj_w"] * scaling).astype(compute_dtype)
    bq = (params["q_proj_b"] * scaling).astype(f32)
    wk = params["k_proj_w"].astype(compute_dtype)
    wv = params["v_proj_w"].astype(compute_dtype)
    bv = params["v_proj_b"].astype(f32)
    wo = params["out_proj_w"].astype(compute_dtype)
    bo = params["out_proj_b"].astype(f32)

    cparams_2d = pltpu.CompilerParams(
        dimension_semantics=("parallel", "parallel"),
        vmem_limit_bytes=vmem_limit_bytes)

    # -------- q/k/v projection, tiled over (B, T_pad) -----------------------
    row_spec = pl.BlockSpec((1, tm, E), lambda b, i: (b, i, 0))
    w_spec = pl.BlockSpec((E, E), lambda b, i: (0, 0))
    b_spec = pl.BlockSpec((1, E), lambda b, i: (0, 0))
    # TODO(synk): on v7x the resident (E,E) weights are still double-buffered;
    # single-buffering them (pipeline_mode) would free ~half that residency.
    q, k, v = pl.pallas_call(
        functools.partial(_qkv_proj_kernel, dot_dtype=compute_dtype),
        out_shape=tuple(jax.ShapeDtypeStruct((B, T_pad, E), compute_dtype)
                        for _ in range(3)),
        grid_spec=pltpu.PrefetchScalarGridSpec(
            num_scalar_prefetch=0,
            grid=(B, T_pad // tm),
            in_specs=[row_spec, w_spec, w_spec, w_spec, b_spec, b_spec],
            out_specs=[row_spec, row_spec, row_spec]),
        compiler_params=cparams_2d,
    )(x, wq, wk, wv, bq, bv)

    # -------- attention core (head split/merge done via BlockSpecs) ---------
    hpb = _heads_per_block(H, Dh, max_head_lanes)
    HB = H // hpb
    dh_blk = hpb * Dh

    if not output_attentions:
        q_spec = pl.BlockSpec((1, tq, dh_blk), lambda b, h, i, j: (b, i, h))
        kv_spec = pl.BlockSpec((1, tk, dh_blk), lambda b, h, i, j: (b, j, h))
        o_spec = pl.BlockSpec((1, tq, dh_blk), lambda b, h, i, j: (b, i, h))

        ctx = pl.pallas_call(
            functools.partial(_flash_attn_kernel, hpb=hpb, head_dim=Dh,
                              dot_dtype=compute_dtype, kv_len=T,
                              kv_padded=kv_padded),
            out_shape=jax.ShapeDtypeStruct((B, T_pad, E), compute_dtype),
            grid_spec=pltpu.PrefetchScalarGridSpec(
                num_scalar_prefetch=0,
                grid=(B, HB, T_pad // tq, T_pad // tk),
                in_specs=[q_spec, kv_spec, kv_spec],
                out_specs=o_spec,
                scratch_shapes=[pltpu.VMEM((hpb, tq, Dh), compute_dtype),
                                pltpu.VMEM((hpb, tq, 1), f32),
                                pltpu.VMEM((hpb, tq, 1), f32),
                                pltpu.VMEM((hpb, tq, Dh), f32)]),
            compiler_params=pltpu.CompilerParams(
                dimension_semantics=("parallel", "parallel", "parallel",
                                     "arbitrary"),
                vmem_limit_bytes=vmem_limit_bytes),
        )(q, k, v)
        attn_weights = None
    else:
        tqp = _fit_tile(T_pad, min(q_tile, 256))
        q_spec = pl.BlockSpec((1, tqp, dh_blk), lambda b, h, i: (b, i, h))
        kv_spec = pl.BlockSpec((1, T_pad, dh_blk), lambda b, h, i: (b, 0, h))
        o_spec = pl.BlockSpec((1, tqp, dh_blk), lambda b, h, i: (b, i, h))
        w_spec_out = pl.BlockSpec((1, hpb, tqp, T_pad), lambda b, h, i: (b, h, i, 0))

        ctx, attn_weights = pl.pallas_call(
            functools.partial(_attn_probs_kernel, hpb=hpb, head_dim=Dh,
                              dot_dtype=compute_dtype, kv_len=T,
                              kv_padded=kv_padded),
            out_shape=(jax.ShapeDtypeStruct((B, T_pad, E), compute_dtype),
                       jax.ShapeDtypeStruct((B, H, T_pad, T_pad), probs_dtype)),
            grid_spec=pltpu.PrefetchScalarGridSpec(
                num_scalar_prefetch=0,
                grid=(B, HB, T_pad // tqp),
                in_specs=[q_spec, kv_spec, kv_spec],
                out_specs=[o_spec, w_spec_out]),
            compiler_params=pltpu.CompilerParams(
                dimension_semantics=("parallel", "parallel", "parallel"),
                vmem_limit_bytes=vmem_limit_bytes),
        )(q, k, v)

    # -------- output projection, tiled over (B, T_pad) ----------------------
    wo_spec = pl.BlockSpec((E, E), lambda b, i: (0, 0))
    bo_spec = pl.BlockSpec((1, E), lambda b, i: (0, 0))
    attn_output = pl.pallas_call(
        functools.partial(_out_proj_kernel, dot_dtype=compute_dtype),
        out_shape=jax.ShapeDtypeStruct((B, T_pad, E), hidden_states.dtype),
        grid_spec=pltpu.PrefetchScalarGridSpec(
            num_scalar_prefetch=0,
            grid=(B, T_pad // tm),
            in_specs=[row_spec, wo_spec, bo_spec],
            out_specs=row_spec),
        compiler_params=cparams_2d,
    )(ctx, wo, bo)

    if kv_padded:
        attn_output = attn_output[:, :T, :]
        if attn_weights is not None:
            attn_weights = attn_weights[:, :, :T, :T]

    # TODO(synk): KV-cache update paths (past_key_value), cross-attention,
    # attention_mask, layer_head_mask and dropout>0/training are not covered.
    return attn_output, attn_weights, None


# ----------------------------------------------------------------------------
# Pure-JAX reference (mirrors the PyTorch forward) for verification.
# ----------------------------------------------------------------------------
def _reference(hidden_states, params, num_heads):
    B, T, E = hidden_states.shape
    H = num_heads
    Dh = E // H
    scaling = float(Dh) ** -0.5
    q = (hidden_states @ params["q_proj_w"] + params["q_proj_b"]) * scaling
    k = hidden_states @ params["k_proj_w"]
    v = hidden_states @ params["v_proj_w"] + params["v_proj_b"]
    sh = lambda x: jnp.transpose(x.reshape(B, T, H, Dh), (0, 2, 1, 3))
    qh, kh, vh = sh(q), sh(k), sh(v)
    w = jax.nn.softmax(jnp.einsum("bhqd,bhkd->bhqk", qh, kh), axis=-1)
    o = jnp.einsum("bhqk,bhkd->bhqd", w, vh)
    o = jnp.transpose(o, (0, 2, 1, 3)).reshape(B, T, E)
    return o @ params["out_proj_w"] + params["out_proj_b"], w


def _make_params(key, E):
    ks = jax.random.split(key, 7)
    scale = 0.05
    return {
        "q_proj_w": scale * jax.random.normal(ks[0], (E, E), jnp.float32),
        "q_proj_b": scale * jax.random.normal(ks[1], (1, E), jnp.float32),
        "k_proj_w": scale * jax.random.normal(ks[2], (E, E), jnp.float32),
        "v_proj_w": scale * jax.random.normal(ks[3], (E, E), jnp.float32),
        "v_proj_b": scale * jax.random.normal(ks[4], (1, E), jnp.float32),
        "out_proj_w": scale * jax.random.normal(ks[5], (E, E), jnp.float32),
        "out_proj_b": scale * jax.random.normal(ks[6], (1, E), jnp.float32),
    }


if __name__ == "__main__":
    key = jax.random.PRNGKey(0)
    kp, kx1, kx2 = jax.random.split(key, 3)

    # Small synthetic config consistent with the module:
    # embed_dim=32, num_heads=4 -> head_dim=8; batch=2, seq=8.
    B, T, E, H = 2, 8, 32, 4
    params = _make_params(kp, E)
    x = jax.random.normal(kx1, (B, T, E), jnp.float32)
    ref_out, ref_w = _reference(x, params, num_heads=H)

    # 1) f32 compute path with attention weights (full-softmax kernel).
    out_f32, w_f32, _ = qwen2_audio_attention(
        x, params, num_heads=H, output_attentions=True,
        compute_dtype=jnp.float32, probs_dtype=jnp.float32)
    out_f32 = jax.block_until_ready(out_f32)
    w_f32 = jax.block_until_ready(w_f32)
    assert out_f32.shape == (B, T, E)
    assert w_f32.shape == (B, H, T, T)
    assert jnp.allclose(out_f32, ref_out, atol=5e-3, rtol=5e-3)
    assert jnp.allclose(w_f32, ref_w, atol=5e-3, rtol=5e-3)

    # 2) f32 compute path, flash (no-weights) kernel.
    out_flash, w_none, _ = qwen2_audio_attention(
        x, params, num_heads=H, output_attentions=False,
        compute_dtype=jnp.float32)
    out_flash = jax.block_until_ready(out_flash)
    assert w_none is None
    assert jnp.allclose(out_flash, ref_out, atol=5e-3, rtol=5e-3)

    # 3) default bf16 compute path (production configuration), flash kernel.
    out_bf16, _, _ = qwen2_audio_attention(x, params, num_heads=H)
    out_bf16 = jax.block_until_ready(out_bf16)
    assert jnp.allclose(out_bf16, ref_out, atol=2e-2, rtol=2e-2)

    # 4) padded + masked path: T=200 (> 128, not a multiple of 128) exercises
    #    the pad-to-256 + key-tail masking in both attention kernels.
    Bp, Tp = 1, 200
    xp = jax.random.normal(kx2, (Bp, Tp, E), jnp.float32)
    ref_out_p, ref_w_p = _reference(xp, params, num_heads=H)

    out_pad, _, _ = qwen2_audio_attention(
        xp, params, num_heads=H, output_attentions=False,
        compute_dtype=jnp.float32)
    out_pad = jax.block_until_ready(out_pad)
    assert out_pad.shape == (Bp, Tp, E)
    assert jnp.allclose(out_pad, ref_out_p, atol=5e-3, rtol=5e-3)

    out_pad_w, w_pad, _ = qwen2_audio_attention(
        xp, params, num_heads=H, output_attentions=True,
        compute_dtype=jnp.float32, probs_dtype=jnp.float32)
    out_pad_w = jax.block_until_ready(out_pad_w)
    w_pad = jax.block_until_ready(w_pad)
    assert w_pad.shape == (Bp, H, Tp, Tp)
    assert jnp.allclose(out_pad_w, ref_out_p, atol=5e-3, rtol=5e-3)
    assert jnp.allclose(w_pad, ref_w_p, atol=5e-3, rtol=5e-3)

    print("KERNEL_OK")
</pallas_src>

<mosaic_0001>
module attributes {stable_mosaic.version = 11 : i64} {
  func.func @_qkv_proj_kernel(%arg0: i32, %arg1: i32, %arg2: memref<1x8x32xf32, #tpu.memory_space<vmem>>, %arg3: memref<32x32xf32, #tpu.memory_space<vmem>>, %arg4: memref<32x32xf32, #tpu.memory_space<vmem>>, %arg5: memref<32x32xf32, #tpu.memory_space<vmem>>, %arg6: memref<1x32xf32, #tpu.memory_space<vmem>>, %arg7: memref<1x32xf32, #tpu.memory_space<vmem>>, %arg8: memref<1x8x32xf32, #tpu.memory_space<vmem>>, %arg9: memref<1x8x32xf32, #tpu.memory_space<vmem>>, %arg10: memref<1x8x32xf32, #tpu.memory_space<vmem>>) attributes {dimension_semantics = [#tpu.dimension_semantics<parallel>, #tpu.dimension_semantics<parallel>], iteration_bounds = array<i64: 2, 1>, scalar_prefetch = 0 : i64, scratch_operands = 0 : i64, tpu.core_type = #tpu.core_type<tc>, window_params = [{transform_indices = @transform_0, window_bounds = array<i64: 1, 8, 32>}, {pipeline_mode = #tpu.pipeline_mode<synchronous>, transform_indices = @transform_1, window_bounds = array<i64: 32, 32>}, {pipeline_mode = #tpu.pipeline_mode<synchronous>, transform_indices = @transform_2, window_bounds = array<i64: 32, 32>}, {pipeline_mode = #tpu.pipeline_mode<synchronous>, transform_indices = @transform_3, window_bounds = array<i64: 32, 32>}, {pipeline_mode = #tpu.pipeline_mode<synchronous>, transform_indices = @transform_4, window_bounds = array<i64: 1, 32>}, {pipeline_mode = #tpu.pipeline_mode<synchronous>, transform_indices = @transform_5, window_bounds = array<i64: 1, 32>}, {transform_indices = @transform_6, window_bounds = array<i64: 1, 8, 32>}, {transform_indices = @transform_7, window_bounds = array<i64: 1, 8, 32>}, {transform_indices = @transform_8, window_bounds = array<i64: 1, 8, 32>}]} {
    %c0 = arith.constant 0 : index
    %c0_0 = arith.constant 0 : index
    %c0_1 = arith.constant 0 : index
    %0 = vector.load %arg2[%c0, %c0_0, %c0_1] : memref<1x8x32xf32, #tpu.memory_space<vmem>>, vector<1x8x32xf32>
    %1 = vector.shape_cast %0 : vector<1x8x32xf32> to vector<8x32xf32>
    %c0_2 = arith.constant 0 : index
    %c0_3 = arith.constant 0 : index
    %2 = vector.load %arg3[%c0_2, %c0_3] : memref<32x32xf32, #tpu.memory_space<vmem>>, vector<32x32xf32>
    %cst = arith.constant dense<0.000000e+00> : vector<8x32xf32>
    %3 = tpu.matmul %1, %2, %cst {dimension_numbers = #tpu.dot_dimension_numbers<[1], [0], [0], [1], [0, 0, 1, 1], [], []>} : vector<8x32xf32>, vector<32x32xf32>, vector<8x32xf32> -> vector<8x32xf32>
    %c0_4 = arith.constant 0 : index
    %c0_5 = arith.constant 0 : index
    %4 = vector.load %arg6[%c0_4, %c0_5] : memref<1x32xf32, #tpu.memory_space<vmem>>, vector<1x32xf32>
    %5 = vector.broadcast %4 : vector<1x32xf32> to vector<8x32xf32>
    %6 = arith.addf %3, %5 : vector<8x32xf32>
    %c0_6 = arith.constant 0 : index
    %c0_7 = arith.constant 0 : index
    %c0_8 = arith.constant 0 : index
    %7 = vector.load %arg8[%c0_6, %c0_7, %c0_8] : memref<1x8x32xf32, #tpu.memory_space<vmem>>, vector<1x8x32xf32>
    %8 = vector.shape_cast %7 : vector<1x8x32xf32> to vector<8x32xf32>
    %9 = vector.shape_cast %6 : vector<8x32xf32> to vector<1x8x32xf32>
    tpu.vector_store %arg8[%c0_6, %c0_7, %c0_8], %9 {strides = array<i32>} : memref<1x8x32xf32, #tpu.memory_space<vmem>>, vector<1x8x32xf32>,
    %c0_9 = arith.constant 0 : index
    %c0_10 = arith.constant 0 : index
    %10 = vector.load %arg4[%c0_9, %c0_10] : memref<32x32xf32, #tpu.memory_space<vmem>>, vector<32x32xf32>
    %cst_11 = arith.constant dense<0.000000e+00> : vector<8x32xf32>
    %11 = tpu.matmul %1, %10, %cst_11 {dimension_numbers = #tpu.dot_dimension_numbers<[1], [0], [0], [1], [0, 0, 1, 1], [], []>} : vector<8x32xf32>, vector<32x32xf32>, vector<8x32xf32> -> vector<8x32xf32>
    %c0_12 = arith.constant 0 : index
    %c0_13 = arith.constant 0 : index
    %c0_14 = arith.constant 0 : index
    %12 = vector.load %arg9[%c0_12, %c0_13, %c0_14] : memref<1x8x32xf32, #tpu.memory_space<vmem>>, vector<1x8x32xf32>
    %13 = vector.shape_cast %12 : vector<1x8x32xf32> to vector<8x32xf32>
    %14 = vector.shape_cast %11 : vector<8x32xf32> to vector<1x8x32xf32>
    tpu.vector_store %arg9[%c0_12, %c0_13, %c0_14], %14 {strides = array<i32>} : memref<1x8x32xf32, #tpu.memory_space<vmem>>, vector<1x8x32xf32>,
    %c0_15 = arith.constant 0 : index
    %c0_16 = arith.constant 0 : index
    %15 = vector.load %arg5[%c0_15, %c0_16] : memref<32x32xf32, #tpu.memory_space<vmem>>, vector<32x32xf32>
    %cst_17 = arith.constant dense<0.000000e+00> : vector<8x32xf32>
    %16 = tpu.matmul %1, %15, %cst_17 {dimension_numbers = #tpu.dot_dimension_numbers<[1], [0], [0], [1], [0, 0, 1, 1], [], []>} : vector<8x32xf32>, vector<32x32xf32>, vector<8x32xf32> -> vector<8x32xf32>
    %c0_18 = arith.constant 0 : index
    %c0_19 = arith.constant 0 : index
    %17 = vector.load %arg7[%c0_18, %c0_19] : memref<1x32xf32, #tpu.memory_space<vmem>>, vector<1x32xf32>
    %18 = vector.broadcast %17 : vector<1x32xf32> to vector<8x32xf32>
    %19 = arith.addf %16, %18 : vector<8x32xf32>
    %c0_20 = arith.constant 0 : index
    %c0_21 = arith.constant 0 : index
    %c0_22 = arith.constant 0 : index
    %20 = vector.load %arg10[%c0_20, %c0_21, %c0_22] : memref<1x8x32xf32, #tpu.memory_space<vmem>>, vector<1x8x32xf32>
    %21 = vector.shape_cast %20 : vector<1x8x32xf32> to vector<8x32xf32>
    %22 = vector.shape_cast %19 : vector<8x32xf32> to vector<1x8x32xf32>
    tpu.vector_store %arg10[%c0_20, %c0_21, %c0_22], %22 {strides = array<i32>} : memref<1x8x32xf32, #tpu.memory_space<vmem>>, vector<1x8x32xf32>,
    return
  }
  func.func @transform_0(%arg0: i32, %arg1: i32) -> (i32, i32, i32) {
    %c0_i32 = arith.constant 0 : i32
    %c0_i32_0 = arith.constant 0 : i32
    return %arg0, %arg1, %c0_i32 : i32, i32, i32
  }
  func.func @transform_1(%arg0: i32, %arg1: i32) -> (i32, i32) {
    %c0_i32 = arith.constant 0 : i32
    %c0_i32_0 = arith.constant 0 : i32
    %c0_i32_1 = arith.constant 0 : i32
    return %c0_i32, %c0_i32_0 : i32, i32
  }
  func.func @transform_2(%arg0: i32, %arg1: i32) -> (i32, i32) {
    %c0_i32 = arith.constant 0 : i32
    %c0_i32_0 = arith.constant 0 : i32
    %c0_i32_1 = arith.constant 0 : i32
    return %c0_i32, %c0_i32_0 : i32, i32
  }
  func.func @transform_3(%arg0: i32, %arg1: i32) -> (i32, i32) {
    %c0_i32 = arith.constant 0 : i32
    %c0_i32_0 = arith.constant 0 : i32
    %c0_i32_1 = arith.constant 0 : i32
    return %c0_i32, %c0_i32_0 : i32, i32
  }
  func.func @transform_4(%arg0: i32, %arg1: i32) -> (i32, i32) {
    %c0_i32 = arith.constant 0 : i32
    %c0_i32_0 = arith.constant 0 : i32
    %c0_i32_1 = arith.constant 0 : i32
    return %c0_i32, %c0_i32_0 : i32, i32
  }
  func.func @transform_5(%arg0: i32, %arg1: i32) -> (i32, i32) {
    %c0_i32 = arith.constant 0 : i32
    %c0_i32_0 = arith.constant 0 : i32
    %c0_i32_1 = arith.constant 0 : i32
    return %c0_i32, %c0_i32_0 : i32, i32
  }
  func.func @transform_6(%arg0: i32, %arg1: i32) -> (i32, i32, i32) {
    %c0_i32 = arith.constant 0 : i32
    %c0_i32_0 = arith.constant 0 : i32
    return %arg0, %arg1, %c0_i32 : i32, i32, i32
  }
  func.func @transform_7(%arg0: i32, %arg1: i32) -> (i32, i32, i32) {
    %c0_i32 = arith.constant 0 : i32
    %c0_i32_0 = arith.constant 0 : i32
    return %arg0, %arg1, %c0_i32 : i32, i32, i32
  }
  func.func @transform_8(%arg0: i32, %arg1: i32) -> (i32, i32, i32) {
    %c0_i32 = arith.constant 0 : i32
    %c0_i32_0 = arith.constant 0 : i32
    return %arg0, %arg1, %c0_i32 : i32, i32, i32
  }
}

</mosaic_0001>

<bundles_post_ra>
// kernel: tpu_custom_call.1
= control target key start
LH: loop header
LB: loop body
LE: loop exit
PB: predicated region body
PF: predicated region fallthrough
CT: control target
= control target key end

     0   :  { %s1767_s0 = inlined_call_operand.hbm [shape: f32[2,8,32], index: 0, kind: input, shape index: {}]   ;;  %s1768_s1 = inlined_call_operand.hbm [shape: f32[32,32], index: 1, kind: input, shape index: {}]   ;;  %s1769_s2 = inlined_call_operand.hbm [shape: f32[32,32], index: 2, kind: input, shape index: {}]   ;;  %s1770_s3 = inlined_call_operand.hbm [shape: f32[32,32], index: 3, kind: input, shape index: {}]   ;;  %s1771_s4 = inlined_call_operand.vmem [shape: f32[1,32], index: 4, kind: input, shape index: {}]   ;;  %s1772_s5 = inlined_call_operand.vmem [shape: f32[1,32], index: 5, kind: input, shape index: {}]   ;;  %s1773_s6 = inlined_call_operand.hbm [shape: f32[2,8,32], index: 6, kind: output, shape index: {0}]   ;;  %s1774_s7 = inlined_call_operand.hbm [shape: f32[2,8,32], index: 7, kind: output, shape index: {1}]   ;;  %s1775_s8 = inlined_call_operand.hbm [shape: f32[2,8,32], index: 8, kind: output, shape index: {2}]  }
   0x1   :  { %1783 = sst [smem:[#allocation21_spill]] %s1772_s5 }
   0x2   :  { %1784 = sst [smem:[#allocation22_spill]] %s1775_s8 }
   0x3   :  { %14 = vsyncpa [#allocation3], 0 }
   0x4   :  { %16 = vsyncpa [#allocation3 + $0x1], 0 }
   0x5   :  { %17 = vsyncpa [#allocation6], 0 }
   0x6   :  { %18 = vsyncpa [#allocation9], 0 }
   0x7   :  { %19 = vsyncpa [#allocation4], 0 }
   0x8   :  { %21 = vsyncpa [#allocation4 + $0x1], 0 }
   0x9   :  { %22 = vsyncpa [#allocation12], 0 }
   0xa   :  { %24 = vsyncpa [#allocation12 + $0x1], 0  ;;  %s1400_s27 = smov 0   ;;  %s1402_s28 = smov 0  }
   0xb   :  { %s1404_s29 = smov 0   ;;  %s1406_s30 = smov 0  }
   0xc   :  { %s1408_s9 = smov 0   ;;  %s1410_s10 = smov 0  }
   0xd LB: > { %1785 = sst [smem:[#allocation19_spill]] %s1321_s27  ;;  %s1431_s11 = sadd.s32 4294967295, %s1341_s10   ;;  %s1341_s10 = sphi %s1410_s10, %s30_s10   ;;  %s1337_s9 = sphi %s1408_s9, %s1812_s9   ;;  %s1333_s30 = sphi %s1406_s30, %s1811_s30   ;;  %s1329_s29 = sphi %s1404_s29, %s1810_s29   ;;  %s1325_s28 = sphi %s1402_s28, %s1809_s28   ;;  %s1321_s27 = sphi %s1400_s27, %s1808_s27  }
   0xe   : > { %s1776_s12 = sadd.s32 4294967294, %s1341_s10   ;;  %p64_p0 = scmp.ne.s32.totalorder %s1325_s28, %s1321_s27 }
   0xf   : > { %p1777_p1 = scmp.eq.s32.totalorder %s1431_s11, 0  ;;  %p201_p3 = scmp.eq.s32.totalorder %s1776_s12, 1 }
  0x10   : > { %p875_p5 = scmp.ge.s32.totalorder %s1341_s10, 1  ;;  %p264_p7 = scmp.lt.s32.totalorder %s1341_s10, 3 }
  0x11   : > { %p1442_p4 = por %p1777_p1, %p64_p0  ;;  %p1447_p6 = por %p201_p3, %p64_p0 }
  0x12   : > { %p1452_p8 = pnand %p875_p5, %p264_p7  ;;  %s1343_s16 = smov [#allocation5]  }
  0x13   : > { %s1786_s13 = scalar_select %p1442_p4, 1, 0 }
  0x14   : > { %s1787_s14 = scalar_select %p1447_p6, 1, 0 }
  0x15   : > { %s1789_s15 = scalar_select %p1452_p8, 1, 0 }
  0x16   : > { %1788 = sst [smem:[#allocation20_spill]] %s1787_s14  ;;  %s276_s17 = sshll.u32 %s1343_s16, 4  ;;  %s1456_s17 = int_to_ptr.vmem [resolvable:$true] %s276_s17 }
  0x17   : > { %p989_p9 = pneg %p1452_p8  ;;  %s1344_s19 = smov [#allocation7]  }
  0x18   : > { %s289_s20 = sshll.u32 %s1344_s19, 4  ;;  %s1345_s21 = smov [#allocation8]   ;;  %s1467_s20 = int_to_ptr.vmem [resolvable:$true] %s289_s20 }
  0x19   : > { %p1463_p11 = pnand %p989_p9, %p1777_p1  ;;  %s1469_s22 = sshll.u32 %s1345_s21, 4  ;;  %s303_s22 = int_to_ptr.vmem [resolvable:$true] %s1469_s22 }
  0x1a   : > { %s1077_s25 = scalar_lea.hbm %s1768_s1, 512 }
  0x1b   : > { %p1078_p12 = scmp.ne.s32.totalorder %s1768_s1, %s1077_s25  ;;  %p1479_p13 = pneg %p1463_p11 }
  0x1c   : > { %p1084_p5 = scmp.lt.u32.totalorder %s1077_s25, %s1768_s1 }
  0x1d   : > { %p1080_p0 = pnand %p1479_p13, %p1078_p12 }
  0x1f   : > { %p1081_p3 = pneg %p1080_p0 }
  0x21   : > { %p1086_p7 = pnand %p1084_p5, %p1081_p3 }
  0x23   : > { %1089 = shalt.err (!%p1086_p7)
}
  0x24   : > { %s1090_s23 = scalar_lea.vmem %s1456_s17, 512  ;;  %p1098_p2 = scmp.lt.s32.totalorder %s1456_s17, %s1456_s17 }
  0x25   : > { %p1091_p9 = scmp.ne.s32.totalorder %s1456_s17, %s1090_s23  ;;  %p1099_p6 = scmp.lt.s32.totalorder %s1090_s23, %s1090_s23 }
  0x27   : > { %p1093_p10 = pnand %p1091_p9, %p1479_p13  ;;  %p1100_p12 = por %p1099_p6, %p1098_p2 }
  0x29   : > { %p1094_p1 = pneg %p1093_p10 }
  0x2b   : > { %p1101_p0 = pnand %p1100_p12, %p1094_p1 }
  0x2d   : > { %1104 = shalt.err (!%p1101_p0)
}
  0x2e   : > { %s1346_s24 = smov 128   ;;  %s1347_s25 = smov 8  }
  0x2f   : > { %992 = dma.hbm_to_vmem [thread:$0]  (!%p1463_p11), %s1768_s1, 512, %s1456_s17, [#allocation6], %s1346_s24, %s1346_s24, %s1347_s25  }
  0x30   : > { %s1105_s23 = scalar_lea.hbm %s1769_s2, 512 }
  0x31   : > { %p1106_p1 = scmp.ne.s32.totalorder %s1769_s2, %s1105_s23  ;;  %p1112_p10 = scmp.lt.u32.totalorder %s1105_s23, %s1769_s2 }
  0x33   : > { %p1108_p2 = pnand %p1106_p1, %p1479_p13 }
  0x35   : > { %p1109_p6 = pneg %p1108_p2 }
  0x37   : > { %p1114_p3 = pnand %p1112_p10, %p1109_p6 }
  0x39   : > { %1117 = shalt.err (!%p1114_p3)
}
  0x3a   : > { %s1118_s17 = scalar_lea.vmem %s1467_s20, 512  ;;  %p1126_p12 = scmp.lt.s32.totalorder %s1467_s20, %s1467_s20 }
  0x3b   : > { %p1119_p5 = scmp.ne.s32.totalorder %s1467_s20, %s1118_s17  ;;  %p1127_p0 = scmp.lt.s32.totalorder %s1118_s17, %s1118_s17 }
  0x3d   : > { %p1121_p7 = pnand %p1119_p5, %p1479_p13  ;;  %p1128_p1 = por %p1127_p0, %p1126_p12 }
  0x3f   : > { %p1122_p9 = pneg %p1121_p7 }
  0x41   : > { %p1129_p2 = pnand %p1128_p1, %p1122_p9 }
  0x43   : > { %1132 = shalt.err (!%p1129_p2)
}
  0x44   : > { %995 = dma.hbm_to_vmem [thread:$0]  (!%p1463_p11), %s1769_s2, 512, %s1467_s20, [#allocation6], %s1346_s24, %s1346_s24, %s1347_s25  }
  0x45   : > { %s1133_s26 = scalar_lea.hbm %s1770_s3, 512 }
  0x46   : > { %p1134_p6 = scmp.ne.s32.totalorder %s1770_s3, %s1133_s26  ;;  %p1140_p5 = scmp.lt.u32.totalorder %s1133_s26, %s1770_s3 }
  0x48   : > { %p1136_p10 = pnand %p1134_p6, %p1479_p13 }
  0x4a   : > { %p1137_p3 = pneg %p1136_p10 }
  0x4c   : > { %p1142_p7 = pnand %p1140_p5, %p1137_p3 }
  0x4e   : > { %1145 = shalt.err (!%p1142_p7)
}
  0x4f   : > { %s1146_s17 = scalar_lea.vmem %s303_s22, 512  ;;  %p1154_p1 = scmp.lt.s32.totalorder %s303_s22, %s303_s22 }
  0x50   : > { %p1147_p9 = scmp.ne.s32.totalorder %s303_s22, %s1146_s17  ;;  %p1155_p2 = scmp.lt.s32.totalorder %s1146_s17, %s1146_s17 }
  0x52   : > { %p1149_p12 = pnand %p1147_p9, %p1479_p13  ;;  %p1156_p4 = por %p1155_p2, %p1154_p1 }
  0x54   : > { %p1150_p0 = pneg %p1149_p12 }
  0x56   : > { %p1157_p8 = pnand %p1156_p4, %p1150_p0 }
  0x58   : > { %1160 = shalt.err (!%p1157_p8)
}
  0x59   : > { %998 = dma.hbm_to_vmem [thread:$0]  (!%p1463_p11), %s1770_s3, 512, %s303_s22, [#allocation9], %s1346_s24, %s1346_s24, %s1347_s25  }
  0x5a   : > { %s51_s12 = sadd.s32 1, %s1329_s29  ;;  %s42_s18 = sadd.s32 1, %s1337_s9 }
  0x5b   : > { %p58_p4 = scmp.ne.s32.totalorder %s1329_s29, %s1325_s28  ;;  %p44_p8 = scmp.ge.s32.totalorder %s42_s18, 2 }
  0x5c   : > { %p59_p13 = scmp.eq.s32.totalorder %s1341_s10, 0  ;;  %p1792_p6 = scmp.eq.s32.totalorder %s1431_s11, 1 }
  0x5d   : > { %p1016_p3 = scmp.lt.s32.totalorder %s1341_s10, 2  ;;  %s1814_s18 = smov (%p44_p8, %s42_s18), 0 }
  0x5e   : > { %p1558_p10 = por %p1792_p6, %p58_p4  ;;  %p60_p5 = por %p59_p13, %p58_p4 }
  0x5f   : > { %s322_s27 = sand.u32 1, %s1329_s29   ;;  %s46_s14 = ssub.s32 %s1337_s9, %s1814_s18 }
  0x60   : > { %p49_p7 = scmp.eq.s32.totalorder %s46_s14, 0  ;;  %s880_s22 = sshll.u32 %s322_s27, 3 }
  0x61   : > { %s881_s24 = sshll.u32 %s1337_s9, 7  ;;  %s326_s21 = scalar_lea.vmem [#allocation2], %s880_s22 }
  0x62   : > { %s1570_s25 = scalar_select %p49_p7, %s1329_s29, %s51_s12  }
  0x63   : > { %s1575_s19 = scalar_lea.hbm %s1767_s0, %s881_s24  ;;  %s334_s23 = sshll.u32 %s326_s21, 4  ;;  %s1577_s23 = int_to_ptr.vmem [resolvable:$true] %s334_s23 }
  0x64   : > { %p1581_p11 = pnand %p1016_p3, %p60_p5  ;;  %s323_s20 = scalar_lea.sflag [#allocation3], %s322_s27 }
  0x65   : > { %s1161_s5 = scalar_lea.hbm %s1575_s19, 128  ;;  %s1166_s22 = scalar_lea.hbm %s1767_s0, 256 }
  0x66   : > { %p1162_p9 = scmp.ne.s32.totalorder %s1575_s19, %s1161_s5  ;;  %p1163_p12 = pneg %p1581_p11 }
  0x67   : > { %p1167_p2 = scmp.lt.u32.totalorder %s1575_s19, %s1767_s0  ;;  %p1168_p4 = scmp.lt.u32.totalorder %s1166_s22, %s1161_s5 }
  0x68   : > { %p1164_p0 = pnand %p1163_p12, %p1162_p9  ;;  %p1170_p13 = scmp.lt.u32.totalorder %s1161_s5, %s1575_s19 }
  0x69   : > { %p1169_p8 = por %p1168_p4, %p1167_p2 }
  0x6a   : > { %p1165_p1 = pneg %p1164_p0 }
  0x6b   : > { %p1171_p6 = por %p1170_p13, %p1169_p8 }
  0x6d   : > { %p1172_p3 = pnand %p1171_p6, %p1165_p1 }
  0x6f   : > { %1175 = shalt.err (!%p1172_p3)
}
  0x70   : > { %s1176_s27 = scalar_lea.vmem %s1577_s23, 128  ;;  %s1348_s16 = smov [#allocation2]  }
  0x71   : > { %p1177_p5 = scmp.ne.s32.totalorder %s1577_s23, %s1176_s27  ;;  %s1181_s21 = sshll.u32 %s1348_s16, 4  ;;  %s1182_s21 = int_to_ptr.vmem [resolvable:$false] %s1181_s21 }
  0x72   : > { %s1183_s12 = scalar_lea.vmem %s1182_s21, 256  ;;  %p1184_p0 = scmp.lt.s32.totalorder %s1577_s23, %s1182_s21 }
  0x73   : > { %p1179_p7 = pnand %p1177_p5, %p1163_p12  ;;  %p1185_p2 = scmp.lt.s32.totalorder %s1183_s12, %s1176_s27 }
  0x75   : > { %p1180_p9 = pneg %p1179_p7  ;;  %p1186_p4 = por %p1185_p2, %p1184_p0 }
  0x77   : > { %p1187_p8 = pnand %p1186_p4, %p1180_p9 }
  0x79   : > { %1190 = shalt.err (!%p1187_p8)
}
  0x7a   : > { %1002 = dma.hbm_to_vmem [thread:$0]  (!%p1581_p11), %s1575_s19, 128, %s1577_s23, %s323_s20  }
  0x7b   : > { %p1795_p1 = scmp.ne.s32.totalorder %s1789_s15, 0 }
  0x7c   : > { %s1613_s5 = sand.u32 (!%p1795_p1), 1, %s1325_s28   ;;  %p1796_p12 = scmp.ne.s32.totalorder (!%p1795_p1), %s1786_s13, 0 }
  0x7d   : > { %343 = sbr.rel (%p1795_p1) target bundleno = 425 (0x1a9), region = 44  ;;  %s1616_s14 = sshll.u32 (!%p1795_p1), %s1613_s5, 3 }
  0x7e   : > { %s346_s22 = scalar_lea.sflag (!%p1795_p1), [#allocation3], %s1613_s5  ;;  %s349_s24 = scalar_lea.vmem (!%p1795_p1), [#allocation2], %s1616_s14 }
  0x84   : > { %1300 = dma.done.wait (%p1796_p12), %s346_s22, 128  }
  0x85   : > { %1302 = vsyncadd (%p1796_p12), %s346_s22, 4294967168  ;;  %p1797_p11 = scmp.eq.s32.totalorder %s1431_s11, 0 }
  0x87   : > { %1304 = dma.done.wait (%p1797_p11), [#allocation6], 1024   ;;  %p1798_p13 = pmov %p1797_p11 }
  0x88   : > { %p1799_p6 = pmov %p1797_p11 }
  0x89   : > { %1306 = vsyncadd (%p1798_p13), [#allocation6], 4294966272 }
  0x8a   : > { %1308 = dma.done.wait (%p1799_p6), [#allocation9], 512   ;;  %p1800_p3 = pmov %p1799_p6 }
  0x8b   : > { %v1349_v0 = vmov 0.0|0.0   ;;  %vm1350_vm0 = vmmov 0   ;;  %v1351_v1 = vmov 0.0   ;;  %v405_v2 = vld [vmem:[#allocation5] sm:$0xff]  ;;  %v406_v3 = vld [vmem:[#allocation5 + $0x8] sm:$0xff]  ;;  %v407_v4 = vld [vmem:[#allocation5 + $0x10] sm:$0xff] }
  0x8c   : > { %1310 = vsyncadd (%p1800_p3), [#allocation9], 4294966784  ;;  %951 = vmatprep.subr.bf16.mxu0 %v1349_v0  ;;  %926 = vmatprep.mubr.msk.f32.mxu0 %vm1350_vm0, %v1351_v1  ;;  %v952_v5 = vpack.c.bf16 %v406_v3, %v405_v2  ;;  %v408_v6 = vld [vmem:[#allocation5 + $0x18] sm:$0xff]  ;;  %v491_v7 = vld [vmem:[#allocation7] sm:$0xff]  ;;  %vm416_vm1 = vcmask 261120   ;;  %s653_s13 = sand.u32 1, %s1431_s11  }
  0x8d   : > { %957 = vmatprep.subr.bf16.mxu1 %v1349_v0  ;;  %937 = vmatprep.mubr.msk.f32.mxu1 %vm1350_vm0, %v1351_v1  ;;  %v492_v8 = vld [vmem:[#allocation7 + $0x8] sm:$0xff]  ;;  %v955_v9 = vpack.c.bf16 %v408_v6, %v407_v4  ;;  %v493_v11 = vld [vmem:[#allocation7 + $0x10] sm:$0xff]  ;;  %v494_v12 = vld [vmem:[#allocation7 + $0x18] sm:$0xff]  ;;  %s1642_s15 = sshll.u32 %s1333_s30, 7  ;;  %s396_s17 = scalar_lea.vmem [#allocation11], %s1616_s14 }
  0x8e   : > { %953 = vmatpush3.bf16.msra.mxu0 %v952_v5  ;;  %v958_v10 = vpack.c.bf16 %v492_v8, %v491_v7  ;;  %v566_v13 = vld [vmem:[#allocation8] sm:$0xff]  ;;  %v567_v14 = vld [vmem:[#allocation8 + $0x8] sm:$0xff]  ;;  %v961_v15 = vpack.c.bf16 %v494_v12, %v493_v11  ;;  %v404_v16 = vld [vmem:[%s349_s24] sm:$0xff]  ;;  %s687_s20 = sshll.u32 %s396_s17, 4  ;;  %s389_s26 = scalar_lea.vmem [#allocation10], %s1616_s14  ;;  %s1655_s20 = int_to_ptr.vmem [resolvable:$true] %s687_s20 }
  0x8f   : > { %954 = vmatprep.subr.bf16.mxu0 %v1349_v0  ;;  %v964_v17 = vpack.c.bf16 %v567_v14, %v566_v13  ;;  %v568_v18 = vld [vmem:[#allocation8 + $0x10] sm:$0xff]  ;;  %v569_v19 = vld [vmem:[#allocation8 + $0x18] sm:$0xff]  ;;  %s673_s27 = sshll.u32 %s389_s26, 4  ;;  %s1653_s12 = scalar_lea.hbm %s1774_s7, %s1642_s15  ;;  %s1663_s27 = int_to_ptr.vmem [resolvable:$true] %s673_s27 }
  0x90   : > { %959 = vmatpush3.bf16.msra.mxu1 %v958_v10  ;;  %v967_v20 = vpack.c.bf16 %v569_v19, %v568_v18  ;;  %v890_v21 = vld [vmem:[%s1771_s4] ss:$0 sm:$0xff]  ;;  %s1661_s22 = scalar_lea.hbm %s1773_s6, %s1642_s15  ;;  %s1667_s24 = scalar_lea.sflag [#allocation12], %s653_s13 }
  0x91   : > { %960 = vmatprep.subr.bf16.mxu1 %v1349_v0  ;;  %s1191_s19 = scalar_lea.vmem %s1655_s20, 128  ;;  %s1352_s23 = smov [#allocation11]  }
  0x92   : > { %956 = vmatpush3.bf16.msra.mxu0 %v955_v9  ;;  %p1192_p5 = scmp.ne.s32.totalorder %s1655_s20, %s1191_s19  ;;  %s1195_s16 = sshll.u32 %s1352_s23, 4  ;;  %s1196_s16 = int_to_ptr.vmem [resolvable:$false] %s1195_s16 }
  0x93   : > { %963 = vmatprep.subr.bf16.mxu0 %v1349_v0  ;;  %s1197_s21 = scalar_lea.vmem %s1196_s16, 256  ;;  %p1198_p0 = scmp.lt.s32.totalorder %s1655_s20, %s1196_s16 }
  0x94   : > { %962 = vmatpush3.bf16.msra.mxu1 %v961_v15  ;;  %p1193_p7 = pnand %p1192_p5, %p1558_p10  ;;  %p1199_p2 = scmp.lt.s32.totalorder %s1197_s21, %s1191_s19 }
  0x95   : > { %927 = vmatmul.mubr.msk.f32.vlgmr.msra.gmra.mrb[0].mxu0 %vm416_vm1, %v404_v16 }
  0x96   : > { %965 = vmatpush3.bf16.msra.mxu0 %v964_v17  ;;  %948 = vmatprep.mubr.msk.f32.mxu0 %vm1350_vm0, %v1351_v1  ;;  %p1194_p9 = pneg %p1193_p7  ;;  %p1200_p4 = por %p1199_p2, %p1198_p0 }
  0x97   : > { %966 = vmatprep.subr.bf16.mxu0 %v1349_v0  ;;  %938 = vmatmul.mubr.msk.f32.vlgmr.msra.gmra.mrb[0].mxu1 %vm416_vm1, %v404_v16 }
  0x98   : > { %p1201_p8 = pnand %p1200_p4, %p1194_p9 }
  0x9a   : > { %968 = vmatpush3.bf16.msra.mxu0 %v967_v20 }
  0x9d   : > { %949 = vmatmul.mubr.msk.f32.vlgmr.msra.gmra.mrb[2].mxu0 %vm416_vm1, %v404_v16 }
 0x168   : > { %v486_v22 = vpop.f32.mrb[0].mxu0 }
 0x169   : > { %v487_v23 = vadd.f32 %v890_v21, %v486_v22  ;;  %v928_v24 = vpop.f32.mrb[1].mxu0 }
 0x16a   : > { %v561_v25 = vpop.f32.mrb[0].mxu1 }
 0x16b   : > { %565 = vst.msk [vmem:[%s396_s17] sm:$0xff] %vm416_vm1, %v561_v25  ;;  %v939_v26 = vpop.f32.mrb[1].mxu1  ;;  %490 = vst.msk [vmem:[%s389_s26] sm:$0xff] %vm416_vm1, %v487_v23 }
 0x16c   : > { %1204 = shalt.err (!%p1201_p8)
}
 0x16d   : > { %s1205_s13 = scalar_lea.hbm %s1653_s12, 128  ;;  %s1209_s30 = scalar_lea.hbm %s1774_s7, 256 }
 0x16e   : > { %p1206_p1 = scmp.ne.s32.totalorder %s1653_s12, %s1205_s13  ;;  %p1210_p13 = scmp.lt.u32.totalorder %s1653_s12, %s1774_s7 }
 0x16f   : > { %p1211_p6 = scmp.lt.u32.totalorder %s1209_s30, %s1205_s13  ;;  %p1213_p5 = scmp.lt.u32.totalorder %s1205_s13, %s1653_s12 }
 0x170   : > { %p1207_p12 = pnand %p1206_p1, %p1558_p10 }
 0x171   : > { %p1212_p3 = por %p1211_p6, %p1210_p13 }
 0x172   : > { %p1208_p11 = pneg %p1207_p12 }
 0x173   : > { %p1214_p7 = por %p1213_p5, %p1212_p3 }
 0x175   : > { %p1215_p9 = pnand %p1214_p7, %p1208_p11 }
 0x177   : > { %1218 = shalt.err (!%p1215_p9)
}
 0x178   : > { %984 = dma.vmem_to_hbm [thread:$0]  (%p1558_p10), %s1655_s20, 128, %s1653_s12, %s1667_s24  }
 0x179   : > { %s649_s19 = scalar_lea.sflag [#allocation4], %s1613_s5  ;;  %s1219_s16 = scalar_lea.vmem %s1663_s27, 128 }
 0x17a   : > { %p1220_p0 = scmp.ne.s32.totalorder %s1663_s27, %s1219_s16  ;;  %s1353_s21 = smov [#allocation10]  }
 0x17b   : > { %s1223_s13 = sshll.u32 %s1353_s21, 4  ;;  %s1224_s13 = int_to_ptr.vmem [resolvable:$false] %s1223_s13 }
 0x17c   : > { %p1221_p2 = pnand %p1220_p0, %p1558_p10  ;;  %s1225_s17 = scalar_lea.vmem %s1224_s13, 256 }
 0x17d   : > { %p1226_p8 = scmp.lt.s32.totalorder %s1663_s27, %s1224_s13  ;;  %p1227_p1 = scmp.lt.s32.totalorder %s1225_s17, %s1219_s16 }
 0x17e   : > { %p1222_p4 = pneg %p1221_p2 }
 0x17f   : > { %p1228_p12 = por %p1227_p1, %p1226_p8 }
 0x181   : > { %p1229_p11 = pnand %p1228_p12, %p1222_p4 }
 0x183   : > { %1232 = shalt.err (!%p1229_p11)
}
 0x184   : > { %s1233_s5 = scalar_lea.hbm %s1661_s22, 128  ;;  %s1237_s26 = scalar_lea.hbm %s1773_s6, 256 }
 0x185   : > { %p1234_p13 = scmp.ne.s32.totalorder %s1661_s22, %s1233_s5  ;;  %p1238_p5 = scmp.lt.u32.totalorder %s1661_s22, %s1773_s6 }
 0x186   : > { %p1239_p7 = scmp.lt.u32.totalorder %s1237_s26, %s1233_s5  ;;  %p1241_p0 = scmp.lt.u32.totalorder %s1233_s5, %s1661_s22 }
 0x187   : > { %p1235_p6 = pnand %p1234_p13, %p1558_p10 }
 0x188   : > { %p1240_p9 = por %p1239_p7, %p1238_p5 }
 0x189   : > { %p1236_p3 = pneg %p1235_p6 }
 0x18a   : > { %p1242_p2 = por %p1241_p0, %p1240_p9 }
 0x18c   : > { %p1243_p4 = pnand %p1242_p2, %p1236_p3 }
 0x18e   : > { %1246 = shalt.err (!%p1243_p4)
}
 0x18f   : > { %983 = dma.vmem_to_hbm [thread:$0]  (%p1558_p10), %s1663_s27, 128, %s1661_s22, %s649_s19   ;;  %v643_v28 = vpop.f32.mrb[2].mxu0 }
 0x190   : > { %s1801_s21 = sld [smem:[#allocation21_spill]]  ;;  %s403_s13 = scalar_lea.vmem [#allocation13], %s1616_s14  ;;  %v950_v30 = vpop.f32.mrb[3].mxu0 }
 0x191   : > { %s701_s17 = sshll.u32 %s403_s13, 4  ;;  %s1802_s12 = sld [smem:[#allocation22_spill]]  ;;  %s702_s17 = int_to_ptr.vmem [resolvable:$true] %s701_s17 }
 0x192   : > { %s1247_s30 = scalar_lea.vmem %s702_s17, 128  ;;  %s1354_s27 = smov [#allocation13]  }
 0x193   : > { %p1248_p8 = scmp.ne.s32.totalorder %s702_s17, %s1247_s30  ;;  %s1251_s22 = sshll.u32 %s1354_s27, 4  ;;  %s1252_s22 = int_to_ptr.vmem [resolvable:$false] %s1251_s22 }
 0x194   : > { %s1253_s14 = scalar_lea.vmem %s1252_s22, 256  ;;  %p1254_p11 = scmp.lt.s32.totalorder %s702_s17, %s1252_s22 }
 0x195   : > { %p1249_p1 = pnand %p1248_p8, %p1558_p10  ;;  %p1255_p13 = scmp.lt.s32.totalorder %s1253_s14, %s1247_s30 }
 0x196   : > { %v893_v27 = vld [vmem:[%s1801_s21] ss:$0 sm:$0xff] }
 0x197   : > { %v644_v29 = vadd.f32 %v893_v27, %v643_v28  ;;  %s1721_s26 = scalar_lea.hbm %s1802_s12, %s1642_s15  ;;  %p1250_p12 = pneg %p1249_p1 }
 0x198   : > { %p1256_p6 = por %p1255_p13, %p1254_p11 }
 0x199   : > { %647 = vst.msk [vmem:[%s403_s13] sm:$0xff] %vm416_vm1, %v644_v29 }
 0x19a   : > { %p1257_p3 = pnand %p1256_p6, %p1250_p12 }
 0x19c   : > { %1260 = shalt.err (!%p1257_p3)
}
 0x19d   : > { %s1261_s15 = scalar_lea.hbm %s1721_s26, 128  ;;  %s1265_s23 = scalar_lea.hbm %s1802_s12, 256 }
 0x19e   : > { %p1262_p5 = scmp.ne.s32.totalorder %s1721_s26, %s1261_s15  ;;  %p1266_p0 = scmp.lt.u32.totalorder %s1721_s26, %s1802_s12 }
 0x19f   : > { %p1267_p2 = scmp.lt.u32.totalorder %s1265_s23, %s1261_s15  ;;  %p1269_p8 = scmp.lt.u32.totalorder %s1261_s15, %s1721_s26 }
 0x1a0   : > { %p1263_p7 = pnand %p1262_p5, %p1558_p10 }
 0x1a1   : > { %p1268_p4 = por %p1267_p2, %p1266_p0 }
 0x1a2   : > { %p1264_p9 = pneg %p1263_p7 }
 0x1a3   : > { %p1270_p1 = por %p1269_p8, %p1268_p4 }
 0x1a5   : > { %p1271_p12 = pnand %p1270_p1, %p1264_p9 }
 0x1a7   : > { %1274 = shalt.err (!%p1271_p12)
}
 0x1a8   : > { %985 = dma.vmem_to_hbm [thread:$0]  (%p1558_p10), %s702_s17, 128, %s1721_s26, %s1667_s24  }
 0x1a9 PF: > { %s1803_s13 = sld [smem:[#allocation19_spill]]  ;;  %s1804_s5 = sld [smem:[#allocation20_spill]] }
 0x1aa   : > { %p1806_p13 = scmp.ge.s32.totalorder %s1341_s10, 2 }
 0x1af   : > { %s713_s20 = sand.u32 1, %s1803_s13   ;;  %p1805_p11 = scmp.ne.s32.totalorder %s1804_s5, 0 }
 0x1b0   : > { %s714_s30 = scalar_lea.sflag [#allocation4], %s713_s20 }
 0x1b1   : > { %p1004_p6 = pnand %p1806_p13, %p1805_p11 }
 0x1b3   : > { %1312 = dma.done.wait (!%p1004_p6), %s714_s30, 128  }
 0x1b4   : > { %1314 = vsyncadd (!%p1004_p6), %s714_s30, 4294967168  ;;  %s1807_s27 = sadd.s32 4294967294, %s1341_s10  }
 0x1b5   : > { %s722_s22 = sand.u32 1, %s1807_s27  }
 0x1b6   : > { %s723_s14 = scalar_lea.sflag [#allocation12], %s722_s22 }
 0x1b7   : > { %1316 = dma.done.wait (!%p1004_p6), %s723_s14, 256  }
 0x1b8   : > { %1318 = vsyncadd (!%p1004_p6), %s723_s14, 4294967040  ;;  %s30_s10 = sadd.s32 1, %s1341_s10   ;;  %s1808_s27 = smov %s1325_s28 }
 0x1b9   : > { %p27_p10 = scmp.ge.s32.totalorder %s30_s10, 4   ;;  %s1809_s28 = smov %s1329_s29 }
 0x1ba   : > { %s1810_s29 = smov %s1570_s25  ;;  %s1811_s30 = smov %s1337_s9 }
 0x1bb   : > { %s1812_s9 = smov %s1814_s18  ;;  %29 = sbr.rel (!%p27_p10) target bundleno = 13 (0xd), region = 133 }
 0x1c2   :  { %737 = vsyncpa [#allocation3], 1 }
 0x1c3   :  { %739 = vsyncpa [#allocation3 + $0x1], 1 }
 0x1c4   :  { %740 = vsyncpa [#allocation6], 1 }
 0x1c5   :  { %741 = vsyncpa [#allocation9], 1 }
 0x1c6   :  { %742 = vsyncpa [#allocation4], 1 }
 0x1c7   :  { %744 = vsyncpa [#allocation4 + $0x1], 1 }
 0x1c8   :  { %745 = vsyncpa [#allocation12], 1 }
 0x1c9   :  { %747 = vsyncpa [#allocation12 + $0x1], 1 }

</bundles_post_ra>
